<compile_context>
chip_gen: v6e
topology: v6e:2x2x1
jax: 0.10.0
libtpu: 0.0.40
codegen_flags: <defaults>
</compile_context>

<pallas_src>
import math
import functools

import jax
import jax.numpy as jnp
from jax import lax
from jax.experimental import pallas as pl
from jax.experimental.pallas import tpu as pltpu


# ---------------------------------------------------------------------------
# Fused kernel: QKV projection + attention + output projection (per batch, head)
# ---------------------------------------------------------------------------
def _attn_kernel(x_ref, wqkv_ref, bqkv_ref, wp_ref, bp_ref, *out_refs,
                 hd, fused_qkv, weights_resident, write_att, bf16_scores, bf16_av):
    h = pl.program_id(1)
    y_ref = out_refs[0]
    widx = h if weights_resident else 0          # resident weights: index head here
    f32 = jnp.float32

    xb = x_ref[0]                                # (T, C), f32 or bf16 (wrapper choice)

    if fused_qkv:
        # hd % 128 == 0: the q/k/v splits below land on 128-lane boundaries (free).
        qkv = jnp.dot(xb, wqkv_ref[widx], preferred_element_type=f32) + bqkv_ref[widx]
        q = qkv[:, 0 * hd:1 * hd]                # scale already folded into Wq/bq
        k = qkv[:, 1 * hd:2 * hd]
        v = qkv[:, 2 * hd:3 * hd]
    else:
        # hd not lane-aligned: three matmuls from the same resident x block instead
        # of slicing a fused (T, 3*hd) result mid-vreg (would force relayout copies).
        q = jnp.dot(xb, wqkv_ref[widx, 0], preferred_element_type=f32) + bqkv_ref[widx, 0]
        k = jnp.dot(xb, wqkv_ref[widx, 1], preferred_element_type=f32) + bqkv_ref[widx, 1]
        v = jnp.dot(xb, wqkv_ref[widx, 2], preferred_element_type=f32) + bqkv_ref[widx, 2]

    # scores: contract the hd dims directly ("qd,kd->qk"); no explicit k.T transpose.
    dnums = (((1,), (1,)), ((), ()))
    if bf16_scores:
        s = lax.dot_general(q.astype(jnp.bfloat16), k.astype(jnp.bfloat16),
                            dimension_numbers=dnums, preferred_element_type=f32)
    else:
        s = lax.dot_general(q, k, dimension_numbers=dnums, preferred_element_type=f32)

    # softmax over last axis (f32); approx reciprocal (EUP slot) when att is not
    # an external output, exact divide otherwise.
    m = jnp.max(s, axis=-1, keepdims=True)
    e = jnp.exp(s - m)
    denom = jnp.sum(e, axis=-1, keepdims=True)
    att = e * pl.reciprocal(denom, approx=not write_att)              # (T, T) f32

    # att @ v and the per-head slab of the output projection (bf16 MXU operands,
    # f32 accumulation).
    if bf16_av:
        yh = jnp.dot(att.astype(jnp.bfloat16), v.astype(jnp.bfloat16),
                     preferred_element_type=f32)
        yh = yh.astype(jnp.bfloat16)
    else:
        yh = jnp.dot(att, v, preferred_element_type=f32)
    yo = jnp.dot(yh, wp_ref[widx], preferred_element_type=f32)        # (T, C)

    # Accumulate into the per-batch output block, resident across the head
    # ("arbitrary") axis.
    @pl.when(h == 0)
    def _():
        y_ref[0] = yo + bp_ref[...]

    @pl.when(h > 0)
    def _():
        y_ref[0] = y_ref[0] + yo

    if write_att:
        out_refs[1][0, 0] = att.astype(out_refs[1].dtype)


def self_attention_forward(x, params, n_head, *, return_att=True, mxu_bf16=True,
                           att_dtype=jnp.float32,
                           max_resident_weight_bytes=16 << 20):
    """x: (B, T, C) float32. Returns (y, att) like the PyTorch module.
    return_att=False skips the O(B*nh*T^2) HBM writeback and returns (y, None)."""
    B, T, C = x.shape
    assert C % n_head == 0
    hd = C // n_head
    scale = 1.0 / math.sqrt(hd)

    # Precision policy: att must be near-exact only when it is actually returned.
    precise_scores = return_att or not mxu_bf16
    x_dtype = jnp.float32 if precise_scores else jnp.bfloat16
    wp_dtype = jnp.bfloat16 if mxu_bf16 else jnp.float32

    # --- param prep (plain JAX glue, no compute inside the kernel) -----------
    def per_head_w(w):                       # (C, C) -> (n_head, C, hd)
        return w.reshape(C, n_head, hd).transpose(1, 0, 2)

    wq = per_head_w(params["wq"]) * scale    # fold 1/sqrt(hd) into Wq/bq (exact)
    wk = per_head_w(params["wk"])
    wv = per_head_w(params["wv"])
    bq = params["bq"].reshape(n_head, 1, hd) * scale
    bk = params["bk"].reshape(n_head, 1, hd)
    bv = params["bv"].reshape(n_head, 1, hd)

    fused_qkv = (hd % 128 == 0)              # lane-aligned splits only in this case
    if fused_qkv:
        wqkv = jnp.concatenate([wq, wk, wv], axis=-1).astype(x_dtype)   # (nh, C, 3hd)
        bqkv = jnp.concatenate([bq, bk, bv], axis=-1)                   # (nh, 1, 3hd) f32
    else:
        wqkv = jnp.stack([wq, wk, wv], axis=1).astype(x_dtype)          # (nh, 3, C, hd)
        bqkv = jnp.stack([bq, bk, bv], axis=1)                          # (nh, 3, 1, hd) f32

    wp = params["wp"].reshape(n_head, hd, C).astype(wp_dtype)           # (nh, hd, C)
    bp = params["bp"].reshape(1, C).astype(jnp.float32)
    xk = x.astype(x_dtype)

    def _nbytes(a):
        return int(a.size) * a.dtype.itemsize

    # Keep the whole weight stack resident in VMEM (DMA'd once, head-indexed in
    # the kernel) when it fits the budget; otherwise per-head blocks.
    w_bytes = _nbytes(wqkv) + _nbytes(bqkv) + _nbytes(wp)
    weights_resident = w_bytes <= max_resident_weight_bytes

    # --- specs ----------------------------------------------------------------
    x_spec = pl.BlockSpec((1, T, C), lambda b, h: (b, 0, 0))
    bp_spec = pl.BlockSpec((1, C), lambda b, h: (0, 0))

    if weights_resident:
        zq = (0,) * wqkv.ndim
        zb = (0,) * bqkv.ndim
        wqkv_spec = pl.BlockSpec(wqkv.shape, lambda b, h: zq)
        bqkv_spec = pl.BlockSpec(bqkv.shape, lambda b, h: zb)
        wp_spec = pl.BlockSpec(wp.shape, lambda b, h: (0, 0, 0))
    else:
        if fused_qkv:
            wqkv_spec = pl.BlockSpec((1, C, 3 * hd), lambda b, h: (h, 0, 0))
            bqkv_spec = pl.BlockSpec((1, 1, 3 * hd), lambda b, h: (h, 0, 0))
        else:
            wqkv_spec = pl.BlockSpec((1, 3, C, hd), lambda b, h: (h, 0, 0, 0))
            bqkv_spec = pl.BlockSpec((1, 3, 1, hd), lambda b, h: (h, 0, 0, 0))
        wp_spec = pl.BlockSpec((1, hd, C), lambda b, h: (h, 0, 0))

    in_specs = [x_spec, wqkv_spec, bqkv_spec, wp_spec, bp_spec]

    y_shape = jax.ShapeDtypeStruct((B, T, C), jnp.float32)
    y_spec = pl.BlockSpec((1, T, C), lambda b, h: (b, 0, 0))   # resident across h
    if return_att:
        out_shape = (y_shape,
                     jax.ShapeDtypeStruct((B, n_head, T, T), att_dtype))
        out_specs = [y_spec,
                     pl.BlockSpec((1, 1, T, T), lambda b, h: (b, h, 0, 0))]
    else:
        out_shape = y_shape
        out_specs = y_spec

    # --- scoped-VMEM sizing (v5e's 16 MiB default is the tightest) ------------
    def _bs(shape, dtype):
        n = 1
        for d in shape:
            n *= int(d)
        return n * jnp.dtype(dtype).itemsize

    vmem_est = 2 * _bs((1, T, C), x_dtype)            # x block (double-buffered)
    vmem_est += 2 * _bs((1, T, C), jnp.float32)       # resident y block
    if return_att:
        vmem_est += 2 * _bs((1, 1, T, T), att_dtype)  # att output block
    vmem_est += 2 * ((_nbytes(wqkv) + _nbytes(bqkv) + _nbytes(wp))
                     if weights_resident else
                     (_nbytes(wqkv) + _nbytes(bqkv) + _nbytes(wp)) // n_head)
    vmem_est += 2 * _nbytes(bp)
    vmem_est += 4 * T * T * 4 + 4 * T * 3 * hd * 4    # s/e/att + q/k/v intermediates
    vmem_limit = int(min(max(vmem_est * 3 // 2, 32 << 20), 100 << 20))

    kernel = functools.partial(
        _attn_kernel, hd=hd, fused_qkv=fused_qkv,
        weights_resident=weights_resident, write_att=return_att,
        bf16_scores=(mxu_bf16 and not precise_scores), bf16_av=mxu_bf16)

    out = pl.pallas_call(
        kernel,
        out_shape=out_shape,
        grid_spec=pltpu.PrefetchScalarGridSpec(
            num_scalar_prefetch=0,
            grid=(B, n_head),                 # head axis last: serial reduction into y
            in_specs=in_specs,
            out_specs=out_specs,
        ),
        compiler_params=pltpu.CompilerParams(
            dimension_semantics=("parallel", "arbitrary"),
            vmem_limit_bytes=vmem_limit),
    )(xk, wqkv, bqkv, wp, bp)

    if return_att:
        y, att = out
        return y, att
    return out, None


# ---------------------------------------------------------------------------
# Pure-JAX reference (mirrors the PyTorch forward) for correctness checks
# ---------------------------------------------------------------------------
def reference_forward(x, params, n_head):
    B, T, C = x.shape
    hd = C // n_head
    q = (x @ params["wq"] + params["bq"]).reshape(B, T, n_head, hd).transpose(0, 2, 1, 3)
    k = (x @ params["wk"] + params["bk"]).reshape(B, T, n_head, hd).transpose(0, 2, 1, 3)
    v = (x @ params["wv"] + params["bv"]).reshape(B, T, n_head, hd).transpose(0, 2, 1, 3)
    att = jnp.einsum("bhqd,bhkd->bhqk", q, k) * (1.0 / math.sqrt(hd))
    att = jax.nn.softmax(att, axis=-1)
    y = jnp.einsum("bhqk,bhkd->bhqd", att, v)
    y = y.transpose(0, 2, 1, 3).reshape(B, T, C)
    y = y @ params["wp"] + params["bp"]
    return y, att


if __name__ == "__main__":
    def make_params(key, C):
        ks = jax.random.split(key, 8)
        std = 1.0 / math.sqrt(C)
        return {
            "wq": jax.random.normal(ks[0], (C, C), jnp.float32) * std,
            "bq": jax.random.normal(ks[1], (C,), jnp.float32) * std,
            "wk": jax.random.normal(ks[2], (C, C), jnp.float32) * std,
            "bk": jax.random.normal(ks[3], (C,), jnp.float32) * std,
            "wv": jax.random.normal(ks[4], (C, C), jnp.float32) * std,
            "bv": jax.random.normal(ks[5], (C,), jnp.float32) * std,
            "wp": jax.random.normal(ks[6], (C, C), jnp.float32) * std,
            "bp": jax.random.normal(ks[7], (C,), jnp.float32) * std,
        }

    key = jax.random.PRNGKey(0)
    k1, k2, k3, k4 = jax.random.split(key, 4)

    # ---- case 1: hd=8 (split-QKV path), resident weights, exact att ----------
    B, T, C, n_head = 2, 8, 32, 4
    params = make_params(k1, C)
    x = jax.random.normal(k2, (B, T, C), jnp.float32)

    y, att = self_attention_forward(x, params, n_head, return_att=True)
    y = jax.block_until_ready(y)
    att = jax.block_until_ready(att)
    y_ref, att_ref = reference_forward(x, params, n_head)
    assert jnp.allclose(att, att_ref, atol=1e-4, rtol=1e-4), "att mismatch"
    assert jnp.allclose(y, y_ref, atol=3e-2, rtol=3e-2), "y mismatch"

    # ---- case 2: no-att fast path (full bf16 MXU operands), per-head blocks ---
    y2, _ = self_attention_forward(x, params, n_head, return_att=False,
                                   max_resident_weight_bytes=0)
    y2 = jax.block_until_ready(y2)
    assert jnp.allclose(y2, y_ref, atol=6e-2, rtol=6e-2), "y (no-att) mismatch"

    # ---- case 3: hd=128 (lane-aligned fused-QKV path), resident weights -------
    B3, T3, C3, nh3 = 2, 8, 256, 2
    params3 = make_params(k3, C3)
    x3 = jax.random.normal(k4, (B3, T3, C3), jnp.float32)
    y3, att3 = self_attention_forward(x3, params3, nh3, return_att=True)
    y3 = jax.block_until_ready(y3)
    att3 = jax.block_until_ready(att3)
    y3_ref, att3_ref = reference_forward(x3, params3, nh3)
    assert jnp.allclose(att3, att3_ref, atol=1e-4, rtol=1e-4), "att (fused) mismatch"
    assert jnp.allclose(y3, y3_ref, atol=3e-2, rtol=3e-2), "y (fused) mismatch"

    print("KERNEL_OK")
</pallas_src>

<mosaic_0001>
module attributes {stable_mosaic.version = 11 : i64} {
  func.func @_attn_kernel(%arg0: i32, %arg1: i32, %arg2: memref<1x8x32xf32, #tpu.memory_space<vmem>>, %arg3: memref<4x3x32x8xf32, #tpu.memory_space<vmem>>, %arg4: memref<4x3x1x8xf32, #tpu.memory_space<vmem>>, %arg5: memref<4x8x32xbf16, #tpu.memory_space<vmem>>, %arg6: memref<1x32xf32, #tpu.memory_space<vmem>>, %arg7: memref<1x8x32xf32, #tpu.memory_space<vmem>>, %arg8: memref<1x1x8x8xf32, #tpu.memory_space<vmem>>) attributes {dimension_semantics = [#tpu.dimension_semantics<parallel>, #tpu.dimension_semantics<arbitrary>], iteration_bounds = array<i64: 2, 4>, scalar_prefetch = 0 : i64, scratch_operands = 0 : i64, tpu.core_type = #tpu.core_type<tc>, window_params = [{transform_indices = @transform_0, window_bounds = array<i64: 1, 8, 32>}, {pipeline_mode = #tpu.pipeline_mode<synchronous>, transform_indices = @transform_1, window_bounds = array<i64: 4, 3, 32, 8>}, {pipeline_mode = #tpu.pipeline_mode<synchronous>, transform_indices = @transform_2, window_bounds = array<i64: 4, 3, 1, 8>}, {pipeline_mode = #tpu.pipeline_mode<synchronous>, transform_indices = @transform_3, window_bounds = array<i64: 4, 8, 32>}, {pipeline_mode = #tpu.pipeline_mode<synchronous>, transform_indices = @transform_4, window_bounds = array<i64: 1, 32>}, {transform_indices = @transform_5, window_bounds = array<i64: 1, 8, 32>}, {transform_indices = @transform_6, window_bounds = array<i64: 1, 1, 8, 8>}]} {
    %c0 = arith.constant 0 : index
    %c0_0 = arith.constant 0 : index
    %c0_1 = arith.constant 0 : index
    %0 = vector.load %arg2[%c0, %c0_0, %c0_1] : memref<1x8x32xf32, #tpu.memory_space<vmem>>, vector<1x8x32xf32>
    %1 = vector.shape_cast %0 : vector<1x8x32xf32> to vector<8x32xf32>
    %2 = arith.index_cast %arg1 : i32 to index
    %c0_2 = arith.constant 0 : index
    %c0_3 = arith.constant 0 : index
    %c0_4 = arith.constant 0 : index
    %3 = vector.load %arg3[%2, %c0_2, %c0_3, %c0_4] : memref<4x3x32x8xf32, #tpu.memory_space<vmem>>, vector<1x1x32x8xf32>
    %4 = vector.shape_cast %3 : vector<1x1x32x8xf32> to vector<32x8xf32>
    %cst = arith.constant dense<0.000000e+00> : vector<8x8xf32>
    %5 = tpu.matmul %1, %4, %cst {dimension_numbers = #tpu.dot_dimension_numbers<[1], [0], [0], [1], [0, 0, 1, 1], [], []>} : vector<8x32xf32>, vector<32x8xf32>, vector<8x8xf32> -> vector<8x8xf32>
    %6 = arith.index_cast %arg1 : i32 to index
    %c0_5 = arith.constant 0 : index
    %c0_6 = arith.constant 0 : index
    %c0_7 = arith.constant 0 : index
    %7 = vector.load %arg4[%6, %c0_5, %c0_6, %c0_7] : memref<4x3x1x8xf32, #tpu.memory_space<vmem>>, vector<1x1x1x8xf32>
    %8 = vector.shape_cast %7 : vector<1x1x1x8xf32> to vector<1x8xf32>
    %9 = vector.broadcast %8 : vector<1x8xf32> to vector<8x8xf32>
    %10 = arith.addf %5, %9 : vector<8x8xf32>
    %11 = arith.index_cast %arg1 : i32 to index
    %c1 = arith.constant 1 : index
    %c0_8 = arith.constant 0 : index
    %c0_9 = arith.constant 0 : index
    %12 = vector.load %arg3[%11, %c1, %c0_8, %c0_9] : memref<4x3x32x8xf32, #tpu.memory_space<vmem>>, vector<1x1x32x8xf32>
    %13 = vector.shape_cast %12 : vector<1x1x32x8xf32> to vector<32x8xf32>
    %cst_10 = arith.constant dense<0.000000e+00> : vector<8x8xf32>
    %14 = tpu.matmul %1, %13, %cst_10 {dimension_numbers = #tpu.dot_dimension_numbers<[1], [0], [0], [1], [0, 0, 1, 1], [], []>} : vector<8x32xf32>, vector<32x8xf32>, vector<8x8xf32> -> vector<8x8xf32>
    %15 = arith.index_cast %arg1 : i32 to index
    %c1_11 = arith.constant 1 : index
    %c0_12 = arith.constant 0 : index
    %c0_13 = arith.constant 0 : index
    %16 = vector.load %arg4[%15, %c1_11, %c0_12, %c0_13] : memref<4x3x1x8xf32, #tpu.memory_space<vmem>>, vector<1x1x1x8xf32>
    %17 = vector.shape_cast %16 : vector<1x1x1x8xf32> to vector<1x8xf32>
    %18 = vector.broadcast %17 : vector<1x8xf32> to vector<8x8xf32>
    %19 = arith.addf %14, %18 : vector<8x8xf32>
    %20 = arith.index_cast %arg1 : i32 to index
    %c2 = arith.constant 2 : index
    %c0_14 = arith.constant 0 : index
    %c0_15 = arith.constant 0 : index
    %21 = vector.load %arg3[%20, %c2, %c0_14, %c0_15] : memref<4x3x32x8xf32, #tpu.memory_space<vmem>>, vector<1x1x32x8xf32>
    %22 = vector.shape_cast %21 : vector<1x1x32x8xf32> to vector<32x8xf32>
    %cst_16 = arith.constant dense<0.000000e+00> : vector<8x8xf32>
    %23 = tpu.matmul %1, %22, %cst_16 {dimension_numbers = #tpu.dot_dimension_numbers<[1], [0], [0], [1], [0, 0, 1, 1], [], []>} : vector<8x32xf32>, vector<32x8xf32>, vector<8x8xf32> -> vector<8x8xf32>
    %24 = arith.index_cast %arg1 : i32 to index
    %c2_17 = arith.constant 2 : index
    %c0_18 = arith.constant 0 : index
    %c0_19 = arith.constant 0 : index
    %25 = vector.load %arg4[%24, %c2_17, %c0_18, %c0_19] : memref<4x3x1x8xf32, #tpu.memory_space<vmem>>, vector<1x1x1x8xf32>
    %26 = vector.shape_cast %25 : vector<1x1x1x8xf32> to vector<1x8xf32>
    %27 = vector.broadcast %26 : vector<1x8xf32> to vector<8x8xf32>
    %28 = arith.addf %23, %27 : vector<8x8xf32>
    %cst_20 = arith.constant dense<0.000000e+00> : vector<8x8xf32>
    %29 = tpu.matmul %10, %19, %cst_20 {dimension_numbers = #tpu.dot_dimension_numbers<[1], [1], [0], [0], [0, 0, 1, 0], [], []>} : vector<8x8xf32>, vector<8x8xf32>, vector<8x8xf32> -> vector<8x8xf32>
    %cst_21 = arith.constant dense<0xFF800000> : vector<8xf32>
    %30 = vector.multi_reduction <maximumf>, %29, %cst_21 [1] : vector<8x8xf32> to vector<8xf32>
    %31 = vector.shape_cast %30 : vector<8xf32> to vector<8x1xf32>
    %32 = vector.broadcast %31 : vector<8x1xf32> to vector<8x8xf32>
    %33 = arith.subf %29, %32 : vector<8x8xf32>
    %34 = math.exp %33 : vector<8x8xf32>
    %cst_22 = arith.constant dense<0.000000e+00> : vector<8xf32>
    %35 = vector.multi_reduction <add>, %34, %cst_22 [1] : vector<8x8xf32> to vector<8xf32>
    %36 = vector.shape_cast %35 : vector<8xf32> to vector<8x1xf32>
    %37 = tpu.reciprocal %36 : vector<8x1xf32> -> vector<8x1xf32>
    %38 = vector.broadcast %37 : vector<8x1xf32> to vector<8x8xf32>
    %39 = arith.mulf %34, %38 : vector<8x8xf32>
    %40 = arith.truncf %39 : vector<8x8xf32> to vector<8x8xbf16>
    %41 = arith.truncf %28 : vector<8x8xf32> to vector<8x8xbf16>
    %cst_23 = arith.constant dense<0.000000e+00> : vector<8x8xf32>
    %42 = tpu.matmul %40, %41, %cst_23 {dimension_numbers = #tpu.dot_dimension_numbers<[1], [0], [0], [1], [0, 0, 1, 1], [], []>} : vector<8x8xbf16>, vector<8x8xbf16>, vector<8x8xf32> -> vector<8x8xf32>
    %43 = arith.truncf %42 : vector<8x8xf32> to vector<8x8xbf16>
    %44 = arith.index_cast %arg1 : i32 to index
    %c0_24 = arith.constant 0 : index
    %c0_25 = arith.constant 0 : index
    %45 = vector.load %arg5[%44, %c0_24, %c0_25] : memref<4x8x32xbf16, #tpu.memory_space<vmem>>, vector<1x8x32xbf16>
    %46 = vector.shape_cast %45 : vector<1x8x32xbf16> to vector<8x32xbf16>
    %cst_26 = arith.constant dense<0.000000e+00> : vector<8x32xf32>
    %47 = tpu.matmul %43, %46, %cst_26 {dimension_numbers = #tpu.dot_dimension_numbers<[1], [0], [0], [1], [0, 0, 1, 1], [], []>} : vector<8x8xbf16>, vector<8x32xbf16>, vector<8x32xf32> -> vector<8x32xf32>
    %c0_i32 = arith.constant 0 : i32
    %48 = arith.cmpi eq, %arg1, %c0_i32 : i32
    %49 = arith.extui %48 : i1 to i32
    %c0_i32_27 = arith.constant 0 : i32
    %50 = arith.cmpi ne, %49, %c0_i32_27 : i32
    scf.if %50 {
      %c0_34 = arith.constant 0 : index
      %c0_35 = arith.constant 0 : index
      %57 = vector.load %arg6[%c0_34, %c0_35] : memref<1x32xf32, #tpu.memory_space<vmem>>, vector<1x32xf32>
      %58 = vector.broadcast %57 : vector<1x32xf32> to vector<8x32xf32>
      %59 = arith.addf %47, %58 : vector<8x32xf32>
      %c0_36 = arith.constant 0 : index
      %c0_37 = arith.constant 0 : index
      %c0_38 = arith.constant 0 : index
      %60 = vector.load %arg7[%c0_36, %c0_37, %c0_38] : memref<1x8x32xf32, #tpu.memory_space<vmem>>, vector<1x8x32xf32>
      %61 = vector.shape_cast %60 : vector<1x8x32xf32> to vector<8x32xf32>
      %62 = vector.shape_cast %59 : vector<8x32xf32> to vector<1x8x32xf32>
      tpu.vector_store %arg7[%c0_36, %c0_37, %c0_38], %62 {strides = array<i32>} : memref<1x8x32xf32, #tpu.memory_space<vmem>>, vector<1x8x32xf32>,
    } else {
    }
    %c0_i32_28 = arith.constant 0 : i32
    %51 = arith.cmpi sgt, %arg1, %c0_i32_28 : i32
    %52 = arith.extui %51 : i1 to i32
    %c0_i32_29 = arith.constant 0 : i32
    %53 = arith.cmpi ne, %52, %c0_i32_29 : i32
    scf.if %53 {
      %c0_34 = arith.constant 0 : index
      %c0_35 = arith.constant 0 : index
      %c0_36 = arith.constant 0 : index
      %57 = vector.load %arg7[%c0_34, %c0_35, %c0_36] : memref<1x8x32xf32, #tpu.memory_space<vmem>>, vector<1x8x32xf32>
      %58 = vector.shape_cast %57 : vector<1x8x32xf32> to vector<8x32xf32>
      %59 = arith.addf %58, %47 : vector<8x32xf32>
      %c0_37 = arith.constant 0 : index
      %c0_38 = arith.constant 0 : index
      %c0_39 = arith.constant 0 : index
      %60 = vector.load %arg7[%c0_37, %c0_38, %c0_39] : memref<1x8x32xf32, #tpu.memory_space<vmem>>, vector<1x8x32xf32>
      %61 = vector.shape_cast %60 : vector<1x8x32xf32> to vector<8x32xf32>
      %62 = vector.shape_cast %59 : vector<8x32xf32> to vector<1x8x32xf32>
      tpu.vector_store %arg7[%c0_37, %c0_38, %c0_39], %62 {strides = array<i32>} : memref<1x8x32xf32, #tpu.memory_space<vmem>>, vector<1x8x32xf32>,
    } else {
    }
    %c0_30 = arith.constant 0 : index
    %c0_31 = arith.constant 0 : index
    %c0_32 = arith.constant 0 : index
    %c0_33 = arith.constant 0 : index
    %54 = vector.load %arg8[%c0_30, %c0_31, %c0_32, %c0_33] : memref<1x1x8x8xf32, #tpu.memory_space<vmem>>, vector<1x1x8x8xf32>
    %55 = vector.shape_cast %54 : vector<1x1x8x8xf32> to vector<8x8xf32>
    %56 = vector.shape_cast %39 : vector<8x8xf32> to vector<1x1x8x8xf32>
    tpu.vector_store %arg8[%c0_30, %c0_31, %c0_32, %c0_33], %56 {strides = array<i32>} : memref<1x1x8x8xf32, #tpu.memory_space<vmem>>, vector<1x1x8x8xf32>,
    return
  }
  func.func @transform_0(%arg0: i32, %arg1: i32) -> (i32, i32, i32) {
    %c0_i32 = arith.constant 0 : i32
    %c0_i32_0 = arith.constant 0 : i32
    %c0_i32_1 = arith.constant 0 : i32
    return %arg0, %c0_i32, %c0_i32_0 : i32, i32, i32
  }
  func.func @transform_1(%arg0: i32, %arg1: i32) -> (i32, i32, i32, i32) {
    %c0_i32 = arith.constant 0 : i32
    %c0_i32_0 = arith.constant 0 : i32
    %c0_i32_1 = arith.constant 0 : i32
    %c0_i32_2 = arith.constant 0 : i32
    %c0_i32_3 = arith.constant 0 : i32
    return %c0_i32, %c0_i32_0, %c0_i32_1, %c0_i32_2 : i32, i32, i32, i32
  }
  func.func @transform_2(%arg0: i32, %arg1: i32) -> (i32, i32, i32, i32) {
    %c0_i32 = arith.constant 0 : i32
    %c0_i32_0 = arith.constant 0 : i32
    %c0_i32_1 = arith.constant 0 : i32
    %c0_i32_2 = arith.constant 0 : i32
    %c0_i32_3 = arith.constant 0 : i32
    return %c0_i32, %c0_i32_0, %c0_i32_1, %c0_i32_2 : i32, i32, i32, i32
  }
  func.func @transform_3(%arg0: i32, %arg1: i32) -> (i32, i32, i32) {
    %c0_i32 = arith.constant 0 : i32
    %c0_i32_0 = arith.constant 0 : i32
    %c0_i32_1 = arith.constant 0 : i32
    %c0_i32_2 = arith.constant 0 : i32
    return %c0_i32, %c0_i32_0, %c0_i32_1 : i32, i32, i32
  }
  func.func @transform_4(%arg0: i32, %arg1: i32) -> (i32, i32) {
    %c0_i32 = arith.constant 0 : i32
    %c0_i32_0 = arith.constant 0 : i32
    %c0_i32_1 = arith.constant 0 : i32
    return %c0_i32, %c0_i32_0 : i32, i32
  }
  func.func @transform_5(%arg0: i32, %arg1: i32) -> (i32, i32, i32) {
    %c0_i32 = arith.constant 0 : i32
    %c0_i32_0 = arith.constant 0 : i32
    %c0_i32_1 = arith.constant 0 : i32
    return %arg0, %c0_i32, %c0_i32_0 : i32, i32, i32
  }
  func.func @transform_6(%arg0: i32, %arg1: i32) -> (i32, i32, i32, i32) {
    %c0_i32 = arith.constant 0 : i32
    %c0_i32_0 = arith.constant 0 : i32
    %c0_i32_1 = arith.constant 0 : i32
    return %arg0, %arg1, %c0_i32, %c0_i32_0 : i32, i32, i32, i32
  }
}

</mosaic_0001>

<bundles_post_ra>
// kernel: tpu_custom_call.1
= control target key start
LH: loop header
LB: loop body
LE: loop exit
PB: predicated region body
PF: predicated region fallthrough
CT: control target
= control target key end

     0   :  { %s1591_s0 = inlined_call_operand.vmem [shape: f32[2,8,32], index: 0, kind: input, shape index: {}]   ;;  %s1592_s1 = inlined_call_operand.vmem [shape: f32[4,3,32,8], index: 1, kind: input, shape index: {}]   ;;  %s1593_s2 = inlined_call_operand.vmem [shape: f32[4,3,1,8], index: 2, kind: input, shape index: {}]   ;;  %s1594_s3 = inlined_call_operand.vmem [shape: bf16[4,8,32], index: 3, kind: input, shape index: {}]   ;;  %s1595_s4 = inlined_call_operand.vmem [shape: f32[1,32], index: 4, kind: input, shape index: {}]   ;;  %s1596_s5 = inlined_call_operand.hbm [shape: f32[2,8,32], index: 5, kind: output, shape index: {0}]   ;;  %s1597_s6 = inlined_call_operand.hbm [shape: f32[2,4,8,8], index: 6, kind: output, shape index: {1}]  }
   0x1   :  { %1605 = sst [smem:[#allocation13_spill]] %s1591_s0 }
   0x2   :  { %1606 = sst [smem:[#allocation14_spill]] %s1592_s1 }
   0x3   :  { %1607 = sst [smem:[#allocation15_spill]] %s1593_s2 }
   0x4   :  { %1608 = sst [smem:[#allocation16_spill]] %s1594_s3 }
   0x5   :  { %1609 = sst [smem:[#allocation17_spill]] %s1595_s4 }
   0x6   :  { %1610 = sst [smem:[#allocation18_spill]] %s1596_s5 }
   0x7   :  { %12 = vsyncpa [#allocation3], 0 }
   0x8   :  { %14 = vsyncpa [#allocation3 + $0x1], 0 }
   0x9   :  { %15 = vsyncpa [#allocation5], 0 }
   0xa   :  { %17 = vsyncpa [#allocation5 + $0x1], 0  ;;  %s1300_s21 = smov 0   ;;  %s1302_s22 = smov 0  }
   0xb   :  { %s1304_s23 = smov 0   ;;  %s1306_s24 = smov 0  }
   0xc   :  { %s1308_s25 = smov 0   ;;  %s1310_s26 = smov 0  }
   0xd   :  { %s1312_s27 = smov 0   ;;  %s1314_s28 = smov 0  }
   0xe   :  { %s1316_s29 = smov 0   ;;  %s1318_s30 = smov 0  }
   0xf   :  { %s1320_s7 = smov 0  }
  0x10 LB: > { %1611 = sst [smem:[#allocation8_spill]] %s1251_s29  ;;  %s897_s8 = sadd.s32 4294967295, %s1259_s7   ;;  %s1259_s7 = sphi %s1320_s7, %s23_s7   ;;  %s1255_s30 = sphi %s1318_s30, %s1637_s30   ;;  %s1251_s29 = sphi %s1316_s29, %s1636_s29   ;;  %s1247_s28 = sphi %s1314_s28, %s1635_s28   ;;  %s1243_s27 = sphi %s1312_s27, %s1634_s27   ;;  %s1239_s26 = sphi %s1310_s26, %s1643_s26   ;;  %s1235_s25 = sphi %s1308_s25, %s1642_s25   ;;  %s1231_s24 = sphi %s1306_s24, %s1641_s24   ;;  %s1227_s23 = sphi %s1304_s23, %s1640_s23   ;;  %s1223_s22 = sphi %s1302_s22, %s1639_s22   ;;  %s1219_s21 = sphi %s1300_s21, %s1638_s21  }
  0x11   : > { %1612 = sst [smem:[#allocation9_spill]] %s1255_s30  ;;  %s898_s9 = sadd.s32 4294967294, %s1259_s7  }
  0x12   : > { %s32_s10 = sadd.s32 1, %s1251_s29  ;;  %s35_s11 = sadd.s32 1, %s1255_s30 }
  0x13   : > { %p33_p0 = scmp.ge.s32.totalorder %s32_s10, 4  ;;  %s152_s12 = sadd.s32 1, %s1239_s26 }
  0x14   : > { %p162_p1 = scmp.ne.s32.totalorder %s1239_s26, %s1235_s25  ;;  %p1362_p2 = scmp.eq.s32.totalorder %s897_s8, 7 }
  0x15   : > { %s1645_s10 = smov (%p33_p0, %s32_s10), 0  ;;  %s1647_s11 = smov (!%p33_p0, %s35_s11), %s1255_s30 }
  0x16   : > { %1614 = sst [smem:[#allocation10_spill]] %s1645_s10  ;;  %p1371_p3 = por %p1362_p2, %p162_p1 }
  0x17   : > { %p168_p4 = scmp.ne.s32.totalorder %s1235_s25, %s1231_s24  ;;  %p37_p5 = scmp.ge.s32.totalorder %s1647_s11, 2 }
  0x18   : > { %p1377_p6 = scmp.eq.s32.totalorder %s898_s9, 7  ;;  %s176_s16 = ssub.s32 %s1251_s29, %s1645_s10 }
  0x19   : > { %s180_s17 = sadd.s32 1, %s1227_s23  ;;  %s1649_s11 = smov (%p37_p5, %s1647_s11), 0 }
  0x1a   : > { %1617 = sst [smem:[#allocation11_spill]] %s1649_s11  ;;  %p1388_p7 = por %p1377_p6, %p168_p4 }
  0x1b   : > { %p190_p8 = scmp.ne.s32.totalorder %s1227_s23, %s1223_s22  ;;  %s149_s19 = ssub.s32 %s1255_s30, %s1649_s11 }
  0x1c   : > { %s1618_s18 = scalar_select %p1388_p7, 1, 0 }
  0x1d   : > { %p196_p9 = scmp.ne.s32.totalorder %s1223_s22, %s1219_s21  ;;  %p150_p10 = scmp.eq.s32.totalorder %s149_s19, 0 }
  0x1e   : > { %s177_s20 = sor.u32 %s176_s16, %s149_s19  ;;  %p1400_p12 = por %p190_p8, %p1362_p2 }
  0x1f   : > { %p178_p11 = scmp.eq.s32.totalorder %s177_s20, 0  ;;  %p1412_p13 = por %p196_p9, %p1377_p6 }
  0x20   : > { %s1405_s9 = scalar_select %p150_p10, %s1239_s26, %s152_s12  }
  0x21   : > { %s1408_s10 = scalar_select %p178_p11, %s1227_s23, %s180_s17  }
  0x22   : > { %1620 = sst [smem:[#allocation12_spill]] %s1405_s9  ;;  %p901_p0 = scmp.ge.s32.totalorder %s1259_s7, 1 }
  0x23   : > { %s1621_s29 = scalar_select %p1412_p13, 1, 0 }
  0x24   : > { %p234_p1 = scmp.lt.s32.totalorder %s1259_s7, 9 }
  0x26   : > { %p235_p4 = pnand %p901_p0, %p234_p1 }
  0x27   : > { %s274_s13 = smul.u32 (!%p235_p4), 96, %s1243_s27  ;;  %s1600_s12 = sand.u32 (!%p235_p4), 1, %s1235_s25  }
  0x28   : > { %238 = sbr.rel (%p235_p4) target bundleno = 1220 (0x4c4), region = 40  ;;  %s1423_s15 = sshll.u32 (!%p235_p4), %s1600_s12, 3 }
  0x29   : > { %s1601_s16 = sand.u32 (!%p235_p4), 1, %s1223_s22   ;;  %s1622_s1 = sld [smem:[#allocation14_spill]] (!%p235_p4) }
  0x2a   : > { %s1439_s12 = sshll.u32 (!%p235_p4), %s1601_s16, 3  ;;  %p268_p2 = scmp.lt.s32.totalorder (!%p235_p4), %s1247_s28, 1 }
  0x2b   : > { %s1623_s0 = sld [smem:[#allocation13_spill]] (!%p235_p4)  ;;  %s280_s16 = smul.u32 (!%p235_p4), 3, %s1243_s27 }
  0x2c   : > { %s1624_s2 = sld [smem:[#allocation15_spill]] (!%p235_p4)  ;;  %p926_p5 = scmp.ne.s32.totalorder (!%p235_p4), %s1243_s27, 0 }
  0x2d   : > { %v1261_v0 = vmov 0.0   ;;  %vm1262_vm0 = vmmov 0   ;;  %vm289_vm1 = vcmask 261120   ;;  %vm533_vm2 = vcmask 64512   ;;  %s1625_s3 = sld [smem:[#allocation16_spill]] }
  0x2e   : > { %968 = vmatprep.subr.mxu1 %v1261_v0  ;;  %957 = vmatprep.subr.mxu0 %v1261_v0  ;;  %vm626_vm3 = vcmask 1043456   ;;  %s1626_s4 = sld [smem:[#allocation17_spill]] (!%p926_p5) }
  0x2f   : > { %s1430_s20 = scalar_lea.vmem %s1622_s1, %s274_s13  ;;  %976 = vmatprep.mubr.msk.f32.mxu1 %vm1262_vm0, %v1261_v0  ;;  %965 = vmatprep.mubr.msk.f32.mxu0 %vm1262_vm0, %v1261_v0 }
  0x30   : > { %v910_v1 = vld [vmem:[%s1430_s20 + $0x38] sm:$0xff]  ;;  %v909_v3 = vld [vmem:[%s1430_s20 + $0x30] sm:$0xff]  ;;  %v908_v5 = vld [vmem:[%s1430_s20 + $0x28] sm:$0xff]  ;;  %s269_s13 = scalar_select %p268_p2, %s1247_s28, 1 }
  0x31   : > { %v279_v2 = vld [vmem:[%s1430_s20 + $0x18] sm:$0xff]  ;;  %969 = vmatpush3.msra.mxu1 %v910_v1  ;;  %v278_v4 = vld [vmem:[%s1430_s20 + $0x10] sm:$0xff]  ;;  %v277_v6 = vld [vmem:[%s1430_s20 + $0x8] sm:$0xff] }
  0x32   : > { %958 = vmatpush3.msra.mxu0 %v279_v2  ;;  %970 = vmatprep.subr.mxu1 %v1261_v0  ;;  %v907_v7 = vld [vmem:[%s1430_s20 + $0x20] sm:$0xff]  ;;  %s904_s17 = sshll.u32 %s269_s13, 3  ;;  %v917_v18 = vld [vmem:[%s1430_s20 + $0x58] sm:$0xff]  ;;  %v916_v19 = vld [vmem:[%s1430_s20 + $0x50] sm:$0xff] }
  0x33   : > { %959 = vmatprep.subr.mxu0 %v1261_v0  ;;  %971 = vmatpush3.msra.mxu1 %v909_v3  ;;  %v276_v8 = vld [vmem:[%s1430_s20] sm:$0xff]  ;;  %s271_s1 = scalar_lea.vmem %s1623_s0, %s904_s17  ;;  %s1471_s17 = scalar_lea.vmem %s1624_s2, %s280_s16  ;;  %v915_v20 = vld [vmem:[%s1430_s20 + $0x48] sm:$0xff] }
  0x34   : > { %960 = vmatpush3.msra.mxu0 %v278_v4  ;;  %972 = vmatprep.subr.mxu1 %v1261_v0  ;;  %v273_v9 = vld [vmem:[%s271_s1] sm:$0xff]  ;;  %s260_s1 = scalar_lea.vmem [#allocation2], %s1423_s15 }
  0x35   : > { %961 = vmatprep.subr.mxu0 %v1261_v0  ;;  %973 = vmatpush3.msra.mxu1 %v908_v5  ;;  %v912_v10 = vld [vmem:[%s1471_s17 + $0x1] ss:$0 sm:$0xff]  ;;  %v905_v11 = vld [vmem:[%s1471_s17] ss:$0 sm:$0xff]  ;;  %v919_v30 = vld [vmem:[%s1471_s17 + $0x2] ss:$0 sm:$0xff] }
  0x36   : > { %962 = vmatpush3.msra.mxu0 %v277_v6  ;;  %974 = vmatprep.subr.mxu1 %v1261_v0  ;;  %v914_v21 = vld [vmem:[%s1430_s20 + $0x40] sm:$0xff]  ;;  %s924_s20 = sshll.u32 %s1243_s27, 2  ;;  %s1604_s17 = scalar_lea.vmem [#allocation4], %s1439_s12 }
  0x37   : > { %963 = vmatprep.subr.mxu0 %v1261_v0  ;;  %975 = vmatpush3.msra.mxu1 %v907_v7  ;;  %s672_s13 = scalar_lea.vmem %s1625_s3, %s924_s20 }
  0x38   : > { %964 = vmatpush3.msra.mxu0 %v276_v8  ;;  %977 = vmatmul.mubr.msk.f32.vlgmr.msra.gmra.mxu1 %vm289_vm1, %v273_v9  ;;  %v673_v40 = vld [vmem:[%s672_s13] sm:$0xf] }
  0x39   : > { %966 = vmatmul.mubr.msk.f32.vlgmr.msra.gmra.mxu0 %vm289_vm1, %v273_v9  ;;  %990 = vmatprep.subr.mxu1 %v1261_v0  ;;  %v678_v41 = vsel %vm626_vm3, %v673_v40, 0 }
  0x3a   : > { %992 = vmatprep.mubr.msk.f32.mxu1 %vm1262_vm0, %v1261_v0  ;;  %979 = vmatprep.subr.mxu0 %v1261_v0 }
  0x3b   : > { %987 = vmatprep.mubr.msk.f32.mxu0 %vm1262_vm0, %v1261_v0  ;;  %980 = vmatpush3.msra.mxu0 %v917_v18 }
  0x3c   : > { %981 = vmatprep.subr.mxu0 %v1261_v0 }
  0x3d   : > { %982 = vmatpush3.msra.mxu0 %v916_v19 }
  0x3e   : > { %983 = vmatprep.subr.mxu0 %v1261_v0 }
  0x3f   : > { %984 = vmatpush3.msra.mxu0 %v915_v20 }
  0x40   : > { %985 = vmatprep.subr.mxu0 %v1261_v0 }
  0x41   : > { %986 = vmatpush3.msra.mxu0 %v914_v21 }
  0x42   : > { %988 = vmatmul.mubr.msk.f32.vlgmr.msra.gmra.mxu0 %vm289_vm1, %v273_v9  ;;  %1001 = vmatprep.subr.bf16.mxu0 %v1261_v0 }
  0x43   : > { %1003 = vmatprep.mubr.msk.bf16.mxu0 %vm1262_vm0, %v1261_v0  ;;  %1002 = vmatpush3.bf16.msra.mxu0 %v678_v41 }
  0xf8   : > { %v444_v12 = vpop.f32.mrf.mxu1 }
  0xf9   : > { %v359_v13 = vpop.f32.mrf.mxu0  ;;  %v445_v14 = vadd.f32 %v912_v10, %v444_v12 }
  0xfa   : > { %v360_v15 = vadd.f32 %v905_v11, %v359_v13  ;;  %v978_v16 = vpop.f32.mrf.mxu1 }
  0xfb   : > { %v967_v17 = vpop.f32.mrf.mxu0  ;;  %991 = vmatpush3.xpose.msk.msra.mxu1 %vm533_vm2, %v445_v14 }
  0xfc   : > { %995 = vmatprep.subr.bf16.mxu1 %v1261_v0 }
  0xfe   : > { %993 = vmatmul.mubr.msk.f32.vlgmr.msra.gmra.mxu1 %vm533_vm2, %v360_v15 }
  0xff   : > { %997 = vmatprep.mubr.msk.bf16.mxu1 %vm1262_vm0, %v1261_v0 }
 0x102   : > { %v529_v31 = vpop.f32.mrf.mxu0 }
 0x103   : > { %v530_v32 = vadd.f32 %v919_v30, %v529_v31 }
 0x104   : > { %v989_v33 = vpop.f32.mrf.mxu0 }
 0x105   : > { %v622_v34 = vpack.c.bf16 %v530_v32, %v530_v32 }
 0x107   : > { %v628_v35 = vsel %vm626_vm3, %v622_v34, 0 }
 0x108   : > { %996 = vmatpush3.bf16.msra.mxu1 %v628_v35 }
 0x1be   : > { %v606_v22 = vpop.f32.mrf.mxu1 }
 0x1bf   : > { %v610_v23 = vsel %vm533_vm2, %v606_v22, -inf }
 0x1c0   : > { %611 = vmax.xlane.f32.xlu0 %v610_v23  ;;  %v994_v24 = vpop.f32.mrf.mxu1 }
 0x249   : > { %v612_v25 = vpop.xlane.xlu0 %611 }
 0x24a   : > { %v613_v26 = vsub.f32 %v606_v22, %v612_v25 }
 0x24c   : > { %v614_v27 = vmul.f32 1.442695, %v613_v26 }
 0x24e   : > { %1109 = vpow2.f32 %v614_v27 }
 0x25b   : > { %v1110_v28 = vpop.eup %1109 }
 0x25c   : > { %v616_v29 = vsel %vm533_vm2, %v1110_v28, 0.0 }
 0x25d   : > { %617 = vadd.xlane.f32.xlu0 %v616_v29 }
 0x2e6   : > { %v618_v36 = vpop.xlane.xlu0 %617 }
 0x2e7   : > { %1111 = vrcp.f32 %v618_v36 }
 0x2f4   : > { %v1112_v37 = vpop.eup %1111 }
 0x2f5   : > { %v620_v38 = vmul.f32 %v1112_v37, %v1110_v28 }
 0x2f7   : > { %v621_v39 = vpack.c.bf16 %v620_v38, %v620_v38 }
 0x2f9   : > { %998 = vmatmul.mubr.msk.bf16.vlgmr.msra.gmra.mxu1 %vm533_vm2, %v621_v39 }
 0x3b9   : > { %v664_v42 = vpop.f32.mrf.mxu1 }
 0x3ba   : > { %v670_v43 = vpack.c.bf16 %v664_v42, %v664_v42 }
 0x3bb   : > { %v999_v44 = vpop.f32.mrf.mxu1 }
 0x3bc   : > { %1004 = vmatmul.mubr.msk.bf16.vlgmr.msra.gmra.mxu0 %vm533_vm2, %v670_v43 }
 0x3bd   : > { %v667_v45 = vpop.f32.mrf.mxu1 }
 0x3bf   : > { %v1000_v46 = vpop.f32.mrf.mxu1 }
 0x47c   : > { %v714_v47 = vpop.f32.mrf.mxu0 }
 0x47e   : > { %v1005_v48 = vpop.f32.mrf.mxu0  ;;  %723 = sbr.rel (%p926_p5) target bundleno = 1159 (0x487), region = 44 }
 0x480   : > { %v717_v49 = vpop.f32.mrf.mxu0 }
 0x482   : > { %v1006_v50 = vpop.f32.mrf.mxu0 }
 0x483   : > { %v927_v51 = vld [vmem:[%s1626_s4] ss:$0 sm:$0xff] }
 0x484   : > { %v731_v52 = vadd.f32 %v927_v51, %v714_v47 }
 0x486   : > { %732 = vst.msk [vmem:[%s260_s1] sm:$0xff] %vm289_vm1, %v731_v52 }
 0x487 PF: > { %p928_p6 = scmp.le.s32.totalorder %s1243_s27, 0 }
 0x489   : > { %736 = sbr.rel (%p928_p6) target bundleno = 1170 (0x492), region = 48 }
 0x48e   : > { %v737_v53 = vld [vmem:[%s260_s1] sm:$0xff] }
 0x48f   : > { %v738_v54 = vadd.f32 %v737_v53, %v714_v47 }
 0x491   : > { %739 = vst.msk [vmem:[%s260_s1] sm:$0xff] %vm289_vm1, %v738_v54 }
 0x492 PF: > { %740 = vst.msk [vmem:[%s1604_s17] sm:$0xff] %vm533_vm2, %v620_v38  ;;  %s931_s15 = sshll.u32 %s1247_s28, 7  ;;  %s1627_s5 = sld [smem:[#allocation18_spill]] }
 0x493   : > { %s760_s19 = sshll.u32 %s260_s1, 4  ;;  %s1628_s0 = sand.u32 1, %s1235_s25   ;;  %s761_s19 = int_to_ptr.vmem [resolvable:$true] %s760_s19 }
 0x494   : > { %s742_s2 = scalar_lea.sflag [#allocation3], %s1628_s0  ;;  %s1113_s3 = scalar_lea.vmem %s761_s19, 128 }
 0x495   : > { %p1114_p8 = scmp.ne.s32.totalorder %s761_s19, %s1113_s3  ;;  %s1263_s4 = smov [#allocation2]  }
 0x496   : > { %s1117_s11 = sshll.u32 %s1263_s4, 4  ;;  %s1118_s11 = int_to_ptr.vmem [resolvable:$false] %s1117_s11 }
 0x497   : > { %p1115_p9 = pnand %p1114_p8, %p1371_p3  ;;  %s1119_s30 = scalar_lea.vmem %s1118_s11, 256 }
 0x498   : > { %s758_s20 = scalar_lea.hbm %s1627_s5, %s931_s15  ;;  %p1120_p11 = scmp.lt.s32.totalorder %s761_s19, %s1118_s11 }
 0x499   : > { %p1116_p10 = pneg %p1115_p9  ;;  %p1121_p0 = scmp.lt.s32.totalorder %s1119_s30, %s1113_s3 }
 0x49b   : > { %p1122_p1 = por %p1121_p0, %p1120_p11 }
 0x49d   : > { %p1123_p4 = pnand %p1122_p1, %p1116_p10 }
 0x49f   : > { %1126 = shalt.err (!%p1123_p4)
}
 0x4a0   : > { %s1127_s16 = scalar_lea.hbm %s758_s20, 128  ;;  %s1131_s15 = scalar_lea.hbm %s1627_s5, 256 }
 0x4a1   : > { %p1128_p2 = scmp.ne.s32.totalorder %s758_s20, %s1127_s16  ;;  %p1132_p8 = scmp.lt.s32.totalorder %s758_s20, %s1627_s5 }
 0x4a2   : > { %p1133_p9 = scmp.lt.s32.totalorder %s1131_s15, %s1127_s16 }
 0x4a3   : > { %p1129_p5 = pnand %p1128_p2, %p1371_p3 }
 0x4a4   : > { %p1134_p13 = por %p1133_p9, %p1132_p8 }
 0x4a5   : > { %p1130_p6 = pneg %p1129_p5 }
 0x4a7   : > { %p1135_p7 = pnand %p1134_p13, %p1130_p6 }
 0x4a9   : > { %1138 = shalt.err (!%p1135_p7)
}
 0x4aa   : > { %1007 = dma.vmem_to_hbm [thread:$0]  (%p1371_p3), %s761_s19, 128, %s758_s20, %s742_s2  }
 0x4ab   : > { %s932_s3 = sshll.u32 %s1247_s28, 2  ;;  %s1629_s4 = scalar_lea.vmem [#allocation4], %s1439_s12 }
 0x4ac   : > { %s775_s30 = sshll.u32 %s1629_s4, 4  ;;  %s771_s11 = sadd.s32 %s1243_s27, %s932_s3  ;;  %s776_s30 = int_to_ptr.vmem [resolvable:$true] %s775_s30 }
 0x4ad   : > { %s933_s0 = sshll.u32 %s771_s11, 7  ;;  %s1630_s15 = sand.u32 1, %s1223_s22  }
 0x4ae   : > { %s773_s16 = scalar_lea.hbm %s1597_s6, %s933_s0  ;;  %s747_s13 = scalar_lea.sflag [#allocation5], %s1630_s15 }
 0x4af   : > { %s1139_s5 = scalar_lea.vmem %s776_s30, 128  ;;  %s1264_s14 = smov [#allocation4]  }
 0x4b0   : > { %p1140_p7 = scmp.ne.s32.totalorder %s776_s30, %s1139_s5  ;;  %s1143_s9 = sshll.u32 %s1264_s14, 4  ;;  %s1144_s9 = int_to_ptr.vmem [resolvable:$false] %s1143_s9 }
 0x4b1   : > { %s1145_s2 = scalar_lea.vmem %s1144_s9, 256  ;;  %p1146_p3 = scmp.lt.s32.totalorder %s776_s30, %s1144_s9 }
 0x4b2   : > { %p1141_p13 = pnand %p1140_p7, %p1400_p12  ;;  %p1147_p11 = scmp.lt.s32.totalorder %s1145_s2, %s1139_s5 }
 0x4b4   : > { %p1142_p10 = pneg %p1141_p13  ;;  %p1148_p0 = por %p1147_p11, %p1146_p3 }
 0x4b6   : > { %p1149_p1 = pnand %p1148_p0, %p1142_p10 }
 0x4b8   : > { %1152 = shalt.err (!%p1149_p1)
}
 0x4b9   : > { %s1153_s27 = scalar_lea.hbm %s773_s16, 128  ;;  %s1157_s20 = scalar_lea.hbm %s1597_s6, 1024 }
 0x4ba   : > { %p1154_p4 = scmp.ne.s32.totalorder %s773_s16, %s1153_s27  ;;  %p1158_p6 = scmp.lt.s32.totalorder %s773_s16, %s1597_s6 }
 0x4bb   : > { %p1159_p8 = scmp.lt.s32.totalorder %s1157_s20, %s1153_s27 }
 0x4bc   : > { %p1155_p2 = pnand %p1154_p4, %p1400_p12 }
 0x4bd   : > { %p1160_p9 = por %p1159_p8, %p1158_p6 }
 0x4be   : > { %p1156_p5 = pneg %p1155_p2 }
 0x4c0   : > { %p1161_p7 = pnand %p1160_p9, %p1156_p5 }
 0x4c2   : > { %1164 = shalt.err (!%p1161_p7)
}
 0x4c3   : > { %1008 = dma.vmem_to_hbm [thread:$0]  (%p1400_p12), %s776_s30, 128, %s773_s16, %s747_s13  }
 0x4c4 PF: > { %p1018_p13 = scmp.ge.s32.totalorder %s1259_s7, 2  ;;  %s787_s5 = sand.u32 1, %s1231_s24  }
 0x4c5   : > { %p1631_p10 = scmp.ne.s32.totalorder %s1618_s18, 0  ;;  %s788_s9 = scalar_lea.sflag [#allocation3], %s787_s5 }
 0x4c7   : > { %p1012_p3 = pnand %p1018_p13, %p1631_p10 }
 0x4c9   : > { %p1013_p11 = pneg %p1012_p3 }
 0x4cb   : > { %1210 = dma.done.wait (%p1013_p11), %s788_s9, 128  }
 0x4cc   : > { %1212 = vsyncadd (%p1013_p11), %s788_s9, 4294967168  ;;  %s796_s4 = sand.u32 1, %s1219_s21   ;;  %p1632_p0 = scmp.ne.s32.totalorder %s1621_s29, 0 }
 0x4cd   : > { %s797_s8 = scalar_lea.sflag [#allocation5], %s796_s4 }
 0x4ce   : > { %p1015_p1 = pnand %p1018_p13, %p1632_p0 }
 0x4d0   : > { %p1016_p4 = pneg %p1015_p1 }
 0x4d2   : > { %1214 = dma.done.wait (%p1016_p4), %s797_s8, 128  }
 0x4d3   : > { %1216 = vsyncadd (%p1016_p4), %s797_s8, 4294967168  ;;  %s23_s7 = sadd.s32 1, %s1259_s7   ;;  %s1633_s18 = sld [smem:[#allocation12_spill]] }
 0x4d4   : > { %p20_p12 = scmp.ge.s32.totalorder %s23_s7, 10   ;;  %s1634_s27 = sld [smem:[#allocation8_spill]] }
 0x4d5   : > { %s1635_s28 = sld [smem:[#allocation9_spill]]  ;;  %s1638_s21 = smov %s1223_s22 }
 0x4d6   : > { %s1636_s29 = sld [smem:[#allocation10_spill]]  ;;  %s1639_s22 = smov %s1227_s23 }
 0x4d7   : > { %s1637_s30 = sld [smem:[#allocation11_spill]]  ;;  %s1640_s23 = smov %s1408_s10 }
 0x4d8   : > { %s1641_s24 = smov %s1235_s25  ;;  %s1642_s25 = smov %s1239_s26 }
 0x4d9   : > { %s1643_s26 = smov %s1633_s18  ;;  %22 = sbr.rel (!%p20_p12) target bundleno = 16 (0x10), region = 107 }
 0x4de   :  { %802 = vsyncpa [#allocation3], 1 }
 0x4df   :  { %804 = vsyncpa [#allocation3 + $0x1], 1 }
 0x4e0   :  { %805 = vsyncpa [#allocation5], 1 }
 0x4e1   :  { %807 = vsyncpa [#allocation5 + $0x1], 1 }

</bundles_post_ra>
